<compile_context>
chip_gen: v7x
topology: tpu7x:2x2x1
jax: 0.10.0
libtpu: 0.0.40
codegen_flags: <defaults>
</compile_context>

<pallas_src>
import functools
import math

import jax
import jax.numpy as jnp
from jax.experimental import pallas as pl
from jax.experimental.pallas import tpu as pltpu

_BN_EPS = 1e-5
_INV_SQRT2 = 0.7071067811865476  # 1/sqrt(2)


def _fused_kernel(x_ref, w_ref, mask_ref, params_ref, o_ref, rhs_ref, *,
                  tap_offsets, C, LSEG, LOUT, N, inv_count, apply_bn, mxu_dtype):
    """Fused conv -> batch-stats BN (optional) -> exact GELU for the whole batch in one step.

    x_ref:      (N, C, PADLEN) bf16  flattened zero-padded images (+ flat tail headroom)
    w_ref:      (OC, KH*KW*C)  bf16  pre-packed conv weight, row order t*C + c (t = kh*KW + kw)
    mask_ref:   (1, N*LSEG)    f32   1.0 at lanes that are real strided conv outputs, else 0.0
    params_ref: (3, OC, 1)     f32   [gamma, beta, bias]
    o_ref:      (N, OC, LOUT)  f32   dense (stride-1) conv grid, channel-major, lane-dense
    rhs_ref:    (KH*KW*C, N*LSEG) f32 scratch: stacked-K matmul RHS (transient, VMEM only)
    """
    # ---- 1) build the stacked-K RHS in VMEM: rhs[t*C + c, n*LSEG + j] = x[n, c, j + tap[t]] ----
    for n in range(N):
        xi = x_ref[n]                                       # (C, PADLEN), one load per image
        for t, d in enumerate(tap_offsets):                 # static unroll (KH*KW taps)
            rhs_ref[t * C:(t + 1) * C, n * LSEG:(n + 1) * LSEG] = (
                xi[:, d:d + LSEG].astype(rhs_ref.dtype))

    # ---- 2) ONE stacked-K MXU matmul: (OC, KK) x (KK, N*LSEG) -> (OC, N*LSEG), f32 acc ----
    conv = jnp.dot(w_ref[...], rhs_ref[...].astype(mxu_dtype),
                   preferred_element_type=jnp.float32)

    # ---- 3) BatchNorm batch statistics + folded per-channel affine, all in-kernel ----
    gamma, beta, bias = params_ref[0], params_ref[1], params_ref[2]      # (OC, 1) each
    if apply_bn:
        m = mask_ref[...]                                   # zero garbage / non-strided lanes
        mean = jnp.sum(conv * m, axis=1, keepdims=True) * inv_count       # (OC, 1)
        cen = (conv - mean) * m                             # two-pass (centred) variance
        var = jnp.sum(cen * cen, axis=1, keepdims=True) * inv_count
        scale = gamma * jax.lax.rsqrt(var + _BN_EPS)
        shift = beta - mean * scale                         # conv bias cancels inside BN
    else:
        scale = jnp.ones_like(gamma)                        # 1x1 spatial output: BN skipped
        shift = bias

    # ---- 4) affine + exact (erf) GELU (matches torch nn.GELU default), lane-dense store ----
    y = conv * scale + shift
    act = 0.5 * y * (1.0 + jax.lax.erf(y * _INV_SQRT2))
    for n in range(N):
        o_ref[n] = act[:, n * LSEG:n * LSEG + LOUT].astype(o_ref.dtype)


def conv_with_norms(x, weight, bias, gamma, beta, *, stride, padding,
                    compute_dtype=jnp.bfloat16):
    """x: [N, C, H, W] f32; weight: [OC, C, KH, KW]; bias/gamma/beta: [OC]. Returns NCHW f32."""
    N, C, H, W = x.shape
    OC, _, KH, KW = weight.shape
    HP, WP = H + 2 * padding, W + 2 * padding
    RD = HP - KH + 1                                   # dense (stride-1) output rows
    OH, OW = (HP - KH) // stride + 1, (WP - KW) // stride + 1
    LOUT = RD * WP                                     # dense flat positions stored per image
    LSEG = -(-LOUT // 128) * 128                       # per-image lane segment, 128-aligned
    NL = N * LSEG
    KK = KH * KW * C
    max_tap = (KH - 1) * WP + (KW - 1)
    extra_rows = max(-(-(max_tap + LSEG - HP * WP) // WP), 0)   # flat tail headroom, whole rows
    PADLEN = (HP + extra_rows) * WP

    # single fused pad(+tail rows) -> flatten -> bf16 pass over x; no HBM im2col
    xflat = jnp.pad(x, ((0, 0), (0, 0), (padding, padding + extra_rows), (padding, padding)))
    xflat = xflat.reshape(N, C, PADLEN).astype(compute_dtype)

    # weights pre-packed once as (OC, KH*KW*C), row order t*C + c with t = kh*KW + kw
    w_packed = weight.transpose(0, 2, 3, 1).reshape(OC, KK).astype(compute_dtype)
    tap_offsets = tuple(kh * WP + kw for kh in range(KH) for kw in range(KW))

    # validity mask over the LSEG dense positions of one image (constant-folded under jit)
    j = jnp.arange(LSEG, dtype=jnp.int32)
    row, col = j // WP, j % WP
    valid = ((row % stride == 0) & (row // stride < OH)
             & (col % stride == 0) & (col // stride < OW))
    mask = jnp.tile(valid.astype(jnp.float32), (N,)).reshape(1, NL)

    params = jnp.stack([gamma, beta, bias]).astype(jnp.float32).reshape(3, OC, 1)

    apply_bn = not (OH == 1 and OW == 1)               # static shape condition, as in the module
    inv_count = 1.0 / float(N * OH * OW)

    kernel = functools.partial(
        _fused_kernel, tap_offsets=tap_offsets, C=C, LSEG=LSEG, LOUT=LOUT, N=N,
        inv_count=inv_count, apply_bn=apply_bn, mxu_dtype=compute_dtype)

    out_dense = pl.pallas_call(
        kernel,
        grid=(1,),                                     # whole batch in one step (launch-bound size)
        in_specs=[
            pl.BlockSpec((N, C, PADLEN), lambda i: (0, 0, 0)),
            pl.BlockSpec((OC, KK), lambda i: (0, 0)),
            pl.BlockSpec((1, NL), lambda i: (0, 0)),
            pl.BlockSpec((3, OC, 1), lambda i: (0, 0, 0)),
        ],
        out_specs=pl.BlockSpec((N, OC, LOUT), lambda i: (0, 0, 0)),
        out_shape=jax.ShapeDtypeStruct((N, OC, LOUT), jnp.float32),
        scratch_shapes=[pltpu.VMEM((KK, NL), jnp.float32)],
        compiler_params=pltpu.CompilerParams(dimension_semantics=("arbitrary",)),
    )(xflat, w_packed, mask, params)

    # (N, OC, RD, WP) is already channel-major; one tiny strided slice trims to NCHW.
    out = out_dense.reshape(N, OC, RD, WP)[:, :, ::stride, ::stride][:, :, :OH, :OW]
    return out


def _reference(x, weight, bias, gamma, beta, *, stride, padding, cast_dtype=None):
    """Pure-JAX reference reproducing the PyTorch forward (optionally with bf16-quantized inputs)."""
    if cast_dtype is not None:
        x = x.astype(cast_dtype).astype(jnp.float32)
        weight = weight.astype(cast_dtype).astype(jnp.float32)
    conv = jax.lax.conv_general_dilated(
        x, weight, window_strides=(stride, stride),
        padding=[(padding, padding), (padding, padding)],
        dimension_numbers=("NCHW", "OIHW", "NCHW"),
        precision=jax.lax.Precision.HIGHEST,
    ) + bias.reshape(1, -1, 1, 1)
    if conv.shape[2] == 1 and conv.shape[3] == 1:
        y = conv
    else:
        mean = jnp.mean(conv, axis=(0, 2, 3), keepdims=True)
        var = jnp.mean((conv - mean) ** 2, axis=(0, 2, 3), keepdims=True)
        y = (conv - mean) * jax.lax.rsqrt(var + _BN_EPS)
        y = y * gamma.reshape(1, -1, 1, 1) + beta.reshape(1, -1, 1, 1)
    return 0.5 * y * (1.0 + jax.lax.erf(y * _INV_SQRT2))


if __name__ == "__main__":
    # Module config: in_channels=4, out_channels=8, kernel=3, stride=1, padding=1
    in_ch, out_ch, ksize, stride, padding = 4, 8, 3, 1, 1
    N, H, W = 2, 16, 16

    key = jax.random.PRNGKey(0)
    kx, kw, kb, kg, kbeta = jax.random.split(key, 5)

    x = jax.random.normal(kx, (N, in_ch, H, W), dtype=jnp.float32)
    fan_in = in_ch * ksize * ksize
    bound = 1.0 / math.sqrt(fan_in)
    weight = jax.random.uniform(kw, (out_ch, in_ch, ksize, ksize),
                                minval=-bound, maxval=bound, dtype=jnp.float32)
    bias = jax.random.uniform(kb, (out_ch,), minval=-bound, maxval=bound, dtype=jnp.float32)
    gamma = 1.0 + 0.1 * jax.random.normal(kg, (out_ch,), dtype=jnp.float32)
    beta = 0.1 * jax.random.normal(kbeta, (out_ch,), dtype=jnp.float32)

    fwd = jax.jit(functools.partial(conv_with_norms, stride=stride, padding=padding))
    out = jax.block_until_ready(fwd(x, weight, bias, gamma, beta))
    assert out.shape == (N, out_ch, H, W), out.shape

    # Tight check vs a reference whose matmul inputs are quantized to bf16 like the kernel's MXU
    # inputs (isolates kernel math from the deliberate bf16 cast).
    ref_bf16 = _reference(x, weight, bias, gamma, beta, stride=stride, padding=padding,
                          cast_dtype=jnp.bfloat16)
    assert jnp.allclose(out, ref_bf16, atol=1e-3, rtol=1e-3), \
        float(jnp.max(jnp.abs(out - ref_bf16)))

    # Looser sanity bound vs the pure-f32 reference (delta comes from bf16 MXU inputs).
    ref_f32 = _reference(x, weight, bias, gamma, beta, stride=stride, padding=padding)
    assert jnp.allclose(out, ref_f32, atol=5e-2, rtol=5e-2), \
        float(jnp.max(jnp.abs(out - ref_f32)))

    print("KERNEL_OK")
</pallas_src>

<mosaic_0001>
module attributes {stable_mosaic.version = 11 : i64} {
  func.func @_fused_kernel(%arg0: i32, %arg1: memref<2x4x432xbf16, #tpu.memory_space<vmem>>, %arg2: memref<8x36xbf16, #tpu.memory_space<vmem>>, %arg3: memref<1x768xf32, #tpu.memory_space<vmem>>, %arg4: memref<3x8x1xf32, #tpu.memory_space<vmem>>, %arg5: memref<2x8x288xf32, #tpu.memory_space<vmem>>, %arg6: memref<36x768xf32, #tpu.memory_space<vmem>>) attributes {dimension_semantics = [#tpu.dimension_semantics<arbitrary>], iteration_bounds = array<i64: 1>, scalar_prefetch = 0 : i64, scratch_operands = 1 : i64, tpu.core_type = #tpu.core_type<tc>, window_params = [{pipeline_mode = #tpu.pipeline_mode<synchronous>, transform_indices = @transform_0, window_bounds = array<i64: 2, 4, 432>}, {pipeline_mode = #tpu.pipeline_mode<synchronous>, transform_indices = @transform_1, window_bounds = array<i64: 8, 36>}, {pipeline_mode = #tpu.pipeline_mode<synchronous>, transform_indices = @transform_2, window_bounds = array<i64: 1, 768>}, {pipeline_mode = #tpu.pipeline_mode<synchronous>, transform_indices = @transform_3, window_bounds = array<i64: 3, 8, 1>}, {pipeline_mode = #tpu.pipeline_mode<synchronous>, transform_indices = @transform_4, window_bounds = array<i64: 2, 8, 288>}]} {
    %c0 = arith.constant 0 : index
    %c0_0 = arith.constant 0 : index
    %c0_1 = arith.constant 0 : index
    %0 = vector.load %arg1[%c0, %c0_0, %c0_1] : memref<2x4x432xbf16, #tpu.memory_space<vmem>>, vector<1x4x432xbf16>
    %1 = vector.shape_cast %0 : vector<1x4x432xbf16> to vector<4x432xbf16>
    %2 = vector.extract_strided_slice %1 {offsets = [0, 0], sizes = [4, 384], strides = [1, 1]} : vector<4x432xbf16> to vector<4x384xbf16>
    %3 = arith.extf %2 : vector<4x384xbf16> to vector<4x384xf32>
    %c0_2 = arith.constant 0 : index
    %c0_3 = arith.constant 0 : index
    %4 = vector.load %arg6[%c0_2, %c0_3] : memref<36x768xf32, #tpu.memory_space<vmem>>, vector<4x384xf32>
    tpu.vector_store %arg6[%c0_2, %c0_3], %3 {strides = array<i32>} : memref<36x768xf32, #tpu.memory_space<vmem>>, vector<4x384xf32>,
    %5 = vector.extract_strided_slice %1 {offsets = [0, 1], sizes = [4, 384], strides = [1, 1]} : vector<4x432xbf16> to vector<4x384xbf16>
    %6 = arith.extf %5 : vector<4x384xbf16> to vector<4x384xf32>
    %c4 = arith.constant 4 : index
    %c0_4 = arith.constant 0 : index
    %7 = vector.load %arg6[%c4, %c0_4] : memref<36x768xf32, #tpu.memory_space<vmem>>, vector<4x384xf32>
    tpu.vector_store %arg6[%c4, %c0_4], %6 {strides = array<i32>} : memref<36x768xf32, #tpu.memory_space<vmem>>, vector<4x384xf32>,
    %8 = vector.extract_strided_slice %1 {offsets = [0, 2], sizes = [4, 384], strides = [1, 1]} : vector<4x432xbf16> to vector<4x384xbf16>
    %9 = arith.extf %8 : vector<4x384xbf16> to vector<4x384xf32>
    %c8 = arith.constant 8 : index
    %c0_5 = arith.constant 0 : index
    %10 = vector.load %arg6[%c8, %c0_5] : memref<36x768xf32, #tpu.memory_space<vmem>>, vector<4x384xf32>
    tpu.vector_store %arg6[%c8, %c0_5], %9 {strides = array<i32>} : memref<36x768xf32, #tpu.memory_space<vmem>>, vector<4x384xf32>,
    %11 = vector.extract_strided_slice %1 {offsets = [0, 18], sizes = [4, 384], strides = [1, 1]} : vector<4x432xbf16> to vector<4x384xbf16>
    %12 = arith.extf %11 : vector<4x384xbf16> to vector<4x384xf32>
    %c12 = arith.constant 12 : index
    %c0_6 = arith.constant 0 : index
    %13 = vector.load %arg6[%c12, %c0_6] : memref<36x768xf32, #tpu.memory_space<vmem>>, vector<4x384xf32>
    tpu.vector_store %arg6[%c12, %c0_6], %12 {strides = array<i32>} : memref<36x768xf32, #tpu.memory_space<vmem>>, vector<4x384xf32>,
    %14 = vector.extract_strided_slice %1 {offsets = [0, 19], sizes = [4, 384], strides = [1, 1]} : vector<4x432xbf16> to vector<4x384xbf16>
    %15 = arith.extf %14 : vector<4x384xbf16> to vector<4x384xf32>
    %c16 = arith.constant 16 : index
    %c0_7 = arith.constant 0 : index
    %16 = vector.load %arg6[%c16, %c0_7] : memref<36x768xf32, #tpu.memory_space<vmem>>, vector<4x384xf32>
    tpu.vector_store %arg6[%c16, %c0_7], %15 {strides = array<i32>} : memref<36x768xf32, #tpu.memory_space<vmem>>, vector<4x384xf32>,
    %17 = vector.extract_strided_slice %1 {offsets = [0, 20], sizes = [4, 384], strides = [1, 1]} : vector<4x432xbf16> to vector<4x384xbf16>
    %18 = arith.extf %17 : vector<4x384xbf16> to vector<4x384xf32>
    %c20 = arith.constant 20 : index
    %c0_8 = arith.constant 0 : index
    %19 = vector.load %arg6[%c20, %c0_8] : memref<36x768xf32, #tpu.memory_space<vmem>>, vector<4x384xf32>
    tpu.vector_store %arg6[%c20, %c0_8], %18 {strides = array<i32>} : memref<36x768xf32, #tpu.memory_space<vmem>>, vector<4x384xf32>,
    %20 = vector.extract_strided_slice %1 {offsets = [0, 36], sizes = [4, 384], strides = [1, 1]} : vector<4x432xbf16> to vector<4x384xbf16>
    %21 = arith.extf %20 : vector<4x384xbf16> to vector<4x384xf32>
    %c24 = arith.constant 24 : index
    %c0_9 = arith.constant 0 : index
    %22 = vector.load %arg6[%c24, %c0_9] : memref<36x768xf32, #tpu.memory_space<vmem>>, vector<4x384xf32>
    tpu.vector_store %arg6[%c24, %c0_9], %21 {strides = array<i32>} : memref<36x768xf32, #tpu.memory_space<vmem>>, vector<4x384xf32>,
    %23 = vector.extract_strided_slice %1 {offsets = [0, 37], sizes = [4, 384], strides = [1, 1]} : vector<4x432xbf16> to vector<4x384xbf16>
    %24 = arith.extf %23 : vector<4x384xbf16> to vector<4x384xf32>
    %c28 = arith.constant 28 : index
    %c0_10 = arith.constant 0 : index
    %25 = vector.load %arg6[%c28, %c0_10] : memref<36x768xf32, #tpu.memory_space<vmem>>, vector<4x384xf32>
    tpu.vector_store %arg6[%c28, %c0_10], %24 {strides = array<i32>} : memref<36x768xf32, #tpu.memory_space<vmem>>, vector<4x384xf32>,
    %26 = vector.extract_strided_slice %1 {offsets = [0, 38], sizes = [4, 384], strides = [1, 1]} : vector<4x432xbf16> to vector<4x384xbf16>
    %27 = arith.extf %26 : vector<4x384xbf16> to vector<4x384xf32>
    %c32 = arith.constant 32 : index
    %c0_11 = arith.constant 0 : index
    %28 = vector.load %arg6[%c32, %c0_11] : memref<36x768xf32, #tpu.memory_space<vmem>>, vector<4x384xf32>
    tpu.vector_store %arg6[%c32, %c0_11], %27 {strides = array<i32>} : memref<36x768xf32, #tpu.memory_space<vmem>>, vector<4x384xf32>,
    %c1 = arith.constant 1 : index
    %c0_12 = arith.constant 0 : index
    %c0_13 = arith.constant 0 : index
    %29 = vector.load %arg1[%c1, %c0_12, %c0_13] : memref<2x4x432xbf16, #tpu.memory_space<vmem>>, vector<1x4x432xbf16>
    %30 = vector.shape_cast %29 : vector<1x4x432xbf16> to vector<4x432xbf16>
    %31 = vector.extract_strided_slice %30 {offsets = [0, 0], sizes = [4, 384], strides = [1, 1]} : vector<4x432xbf16> to vector<4x384xbf16>
    %32 = arith.extf %31 : vector<4x384xbf16> to vector<4x384xf32>
    %c0_14 = arith.constant 0 : index
    %c384 = arith.constant 384 : index
    %33 = vector.load %arg6[%c0_14, %c384] : memref<36x768xf32, #tpu.memory_space<vmem>>, vector<4x384xf32>
    tpu.vector_store %arg6[%c0_14, %c384], %32 {strides = array<i32>} : memref<36x768xf32, #tpu.memory_space<vmem>>, vector<4x384xf32>,
    %34 = vector.extract_strided_slice %30 {offsets = [0, 1], sizes = [4, 384], strides = [1, 1]} : vector<4x432xbf16> to vector<4x384xbf16>
    %35 = arith.extf %34 : vector<4x384xbf16> to vector<4x384xf32>
    %c4_15 = arith.constant 4 : index
    %c384_16 = arith.constant 384 : index
    %36 = vector.load %arg6[%c4_15, %c384_16] : memref<36x768xf32, #tpu.memory_space<vmem>>, vector<4x384xf32>
    tpu.vector_store %arg6[%c4_15, %c384_16], %35 {strides = array<i32>} : memref<36x768xf32, #tpu.memory_space<vmem>>, vector<4x384xf32>,
    %37 = vector.extract_strided_slice %30 {offsets = [0, 2], sizes = [4, 384], strides = [1, 1]} : vector<4x432xbf16> to vector<4x384xbf16>
    %38 = arith.extf %37 : vector<4x384xbf16> to vector<4x384xf32>
    %c8_17 = arith.constant 8 : index
    %c384_18 = arith.constant 384 : index
    %39 = vector.load %arg6[%c8_17, %c384_18] : memref<36x768xf32, #tpu.memory_space<vmem>>, vector<4x384xf32>
    tpu.vector_store %arg6[%c8_17, %c384_18], %38 {strides = array<i32>} : memref<36x768xf32, #tpu.memory_space<vmem>>, vector<4x384xf32>,
    %40 = vector.extract_strided_slice %30 {offsets = [0, 18], sizes = [4, 384], strides = [1, 1]} : vector<4x432xbf16> to vector<4x384xbf16>
    %41 = arith.extf %40 : vector<4x384xbf16> to vector<4x384xf32>
    %c12_19 = arith.constant 12 : index
    %c384_20 = arith.constant 384 : index
    %42 = vector.load %arg6[%c12_19, %c384_20] : memref<36x768xf32, #tpu.memory_space<vmem>>, vector<4x384xf32>
    tpu.vector_store %arg6[%c12_19, %c384_20], %41 {strides = array<i32>} : memref<36x768xf32, #tpu.memory_space<vmem>>, vector<4x384xf32>,
    %43 = vector.extract_strided_slice %30 {offsets = [0, 19], sizes = [4, 384], strides = [1, 1]} : vector<4x432xbf16> to vector<4x384xbf16>
    %44 = arith.extf %43 : vector<4x384xbf16> to vector<4x384xf32>
    %c16_21 = arith.constant 16 : index
    %c384_22 = arith.constant 384 : index
    %45 = vector.load %arg6[%c16_21, %c384_22] : memref<36x768xf32, #tpu.memory_space<vmem>>, vector<4x384xf32>
    tpu.vector_store %arg6[%c16_21, %c384_22], %44 {strides = array<i32>} : memref<36x768xf32, #tpu.memory_space<vmem>>, vector<4x384xf32>,
    %46 = vector.extract_strided_slice %30 {offsets = [0, 20], sizes = [4, 384], strides = [1, 1]} : vector<4x432xbf16> to vector<4x384xbf16>
    %47 = arith.extf %46 : vector<4x384xbf16> to vector<4x384xf32>
    %c20_23 = arith.constant 20 : index
    %c384_24 = arith.constant 384 : index
    %48 = vector.load %arg6[%c20_23, %c384_24] : memref<36x768xf32, #tpu.memory_space<vmem>>, vector<4x384xf32>
    tpu.vector_store %arg6[%c20_23, %c384_24], %47 {strides = array<i32>} : memref<36x768xf32, #tpu.memory_space<vmem>>, vector<4x384xf32>,
    %49 = vector.extract_strided_slice %30 {offsets = [0, 36], sizes = [4, 384], strides = [1, 1]} : vector<4x432xbf16> to vector<4x384xbf16>
    %50 = arith.extf %49 : vector<4x384xbf16> to vector<4x384xf32>
    %c24_25 = arith.constant 24 : index
    %c384_26 = arith.constant 384 : index
    %51 = vector.load %arg6[%c24_25, %c384_26] : memref<36x768xf32, #tpu.memory_space<vmem>>, vector<4x384xf32>
    tpu.vector_store %arg6[%c24_25, %c384_26], %50 {strides = array<i32>} : memref<36x768xf32, #tpu.memory_space<vmem>>, vector<4x384xf32>,
    %52 = vector.extract_strided_slice %30 {offsets = [0, 37], sizes = [4, 384], strides = [1, 1]} : vector<4x432xbf16> to vector<4x384xbf16>
    %53 = arith.extf %52 : vector<4x384xbf16> to vector<4x384xf32>
    %c28_27 = arith.constant 28 : index
    %c384_28 = arith.constant 384 : index
    %54 = vector.load %arg6[%c28_27, %c384_28] : memref<36x768xf32, #tpu.memory_space<vmem>>, vector<4x384xf32>
    tpu.vector_store %arg6[%c28_27, %c384_28], %53 {strides = array<i32>} : memref<36x768xf32, #tpu.memory_space<vmem>>, vector<4x384xf32>,
    %55 = vector.extract_strided_slice %30 {offsets = [0, 38], sizes = [4, 384], strides = [1, 1]} : vector<4x432xbf16> to vector<4x384xbf16>
    %56 = arith.extf %55 : vector<4x384xbf16> to vector<4x384xf32>
    %c32_29 = arith.constant 32 : index
    %c384_30 = arith.constant 384 : index
    %57 = vector.load %arg6[%c32_29, %c384_30] : memref<36x768xf32, #tpu.memory_space<vmem>>, vector<4x384xf32>
    tpu.vector_store %arg6[%c32_29, %c384_30], %56 {strides = array<i32>} : memref<36x768xf32, #tpu.memory_space<vmem>>, vector<4x384xf32>,
    %c0_31 = arith.constant 0 : index
    %c0_32 = arith.constant 0 : index
    %58 = vector.load %arg2[%c0_31, %c0_32] : memref<8x36xbf16, #tpu.memory_space<vmem>>, vector<8x36xbf16>
    %c0_33 = arith.constant 0 : index
    %c0_34 = arith.constant 0 : index
    %59 = vector.load %arg6[%c0_33, %c0_34] : memref<36x768xf32, #tpu.memory_space<vmem>>, vector<36x768xf32>
    %60 = arith.truncf %59 : vector<36x768xf32> to vector<36x768xbf16>
    %cst = arith.constant dense<0.000000e+00> : vector<8x768xf32>
    %61 = tpu.matmul %58, %60, %cst {dimension_numbers = #tpu.dot_dimension_numbers<[1], [0], [0], [1], [0, 0, 1, 1], [], []>} : vector<8x36xbf16>, vector<36x768xbf16>, vector<8x768xf32> -> vector<8x768xf32>
    %c0_35 = arith.constant 0 : index
    %c0_36 = arith.constant 0 : index
    %c0_37 = arith.constant 0 : index
    %62 = vector.load %arg4[%c0_35, %c0_36, %c0_37] : memref<3x8x1xf32, #tpu.memory_space<vmem>>, vector<1x8x1xf32>
    %63 = vector.shape_cast %62 : vector<1x8x1xf32> to vector<8x1xf32>
    %c1_38 = arith.constant 1 : index
    %c0_39 = arith.constant 0 : index
    %c0_40 = arith.constant 0 : index
    %64 = vector.load %arg4[%c1_38, %c0_39, %c0_40] : memref<3x8x1xf32, #tpu.memory_space<vmem>>, vector<1x8x1xf32>
    %65 = vector.shape_cast %64 : vector<1x8x1xf32> to vector<8x1xf32>
    %c0_41 = arith.constant 0 : index
    %c0_42 = arith.constant 0 : index
    %66 = vector.load %arg3[%c0_41, %c0_42] : memref<1x768xf32, #tpu.memory_space<vmem>>, vector<1x768xf32>
    %67 = vector.broadcast %66 : vector<1x768xf32> to vector<8x768xf32>
    %68 = arith.mulf %61, %67 : vector<8x768xf32>
    %cst_43 = arith.constant dense<0.000000e+00> : vector<8xf32>
    %69 = vector.multi_reduction <add>, %68, %cst_43 [1] : vector<8x768xf32> to vector<8xf32>
    %70 = vector.shape_cast %69 : vector<8xf32> to vector<8x1xf32>
    %cst_44 = arith.constant 0.001953125 : f32
    %71 = vector.broadcast %cst_44 : f32 to vector<8x1xf32>
    %72 = arith.mulf %70, %71 : vector<8x1xf32>
    %73 = vector.broadcast %72 : vector<8x1xf32> to vector<8x768xf32>
    %74 = arith.subf %61, %73 : vector<8x768xf32>
    %75 = vector.broadcast %66 : vector<1x768xf32> to vector<8x768xf32>
    %76 = arith.mulf %74, %75 : vector<8x768xf32>
    %77 = arith.mulf %76, %76 : vector<8x768xf32>
    %cst_45 = arith.constant dense<0.000000e+00> : vector<8xf32>
    %78 = vector.multi_reduction <add>, %77, %cst_45 [1] : vector<8x768xf32> to vector<8xf32>
    %79 = vector.shape_cast %78 : vector<8xf32> to vector<8x1xf32>
    %cst_46 = arith.constant 0.001953125 : f32
    %80 = vector.broadcast %cst_46 : f32 to vector<8x1xf32>
    %81 = arith.mulf %79, %80 : vector<8x1xf32>
    %cst_47 = arith.constant 9.99999974E-6 : f32
    %82 = vector.broadcast %cst_47 : f32 to vector<8x1xf32>
    %83 = arith.addf %81, %82 : vector<8x1xf32>
    %84 = math.rsqrt %83 : vector<8x1xf32>
    %85 = arith.mulf %63, %84 : vector<8x1xf32>
    %86 = arith.mulf %72, %85 : vector<8x1xf32>
    %87 = arith.subf %65, %86 : vector<8x1xf32>
    %88 = vector.broadcast %85 : vector<8x1xf32> to vector<8x768xf32>
    %89 = arith.mulf %61, %88 : vector<8x768xf32>
    %90 = vector.broadcast %87 : vector<8x1xf32> to vector<8x768xf32>
    %91 = arith.addf %89, %90 : vector<8x768xf32>
    %cst_48 = arith.constant 5.000000e-01 : f32
    %92 = vector.broadcast %cst_48 : f32 to vector<8x768xf32>
    %93 = arith.mulf %92, %91 : vector<8x768xf32>
    %cst_49 = arith.constant 0.707106769 : f32
    %94 = vector.broadcast %cst_49 : f32 to vector<8x768xf32>
    %95 = arith.mulf %91, %94 : vector<8x768xf32>
    %96 = math.erf %95 : vector<8x768xf32>
    %cst_50 = arith.constant 1.000000e+00 : f32
    %97 = vector.broadcast %cst_50 : f32 to vector<8x768xf32>
    %98 = arith.addf %97, %96 : vector<8x768xf32>
    %99 = arith.mulf %93, %98 : vector<8x768xf32>
    %100 = vector.extract_strided_slice %99 {offsets = [0, 0], sizes = [8, 288], strides = [1, 1]} : vector<8x768xf32> to vector<8x288xf32>
    %c0_51 = arith.constant 0 : index
    %c0_52 = arith.constant 0 : index
    %c0_53 = arith.constant 0 : index
    %101 = vector.load %arg5[%c0_51, %c0_52, %c0_53] : memref<2x8x288xf32, #tpu.memory_space<vmem>>, vector<1x8x288xf32>
    %102 = vector.shape_cast %101 : vector<1x8x288xf32> to vector<8x288xf32>
    %103 = vector.shape_cast %100 : vector<8x288xf32> to vector<1x8x288xf32>
    tpu.vector_store %arg5[%c0_51, %c0_52, %c0_53], %103 {strides = array<i32>} : memref<2x8x288xf32, #tpu.memory_space<vmem>>, vector<1x8x288xf32>,
    %104 = vector.extract_strided_slice %99 {offsets = [0, 384], sizes = [8, 288], strides = [1, 1]} : vector<8x768xf32> to vector<8x288xf32>
    %c1_54 = arith.constant 1 : index
    %c0_55 = arith.constant 0 : index
    %c0_56 = arith.constant 0 : index
    %105 = vector.load %arg5[%c1_54, %c0_55, %c0_56] : memref<2x8x288xf32, #tpu.memory_space<vmem>>, vector<1x8x288xf32>
    %106 = vector.shape_cast %105 : vector<1x8x288xf32> to vector<8x288xf32>
    %107 = vector.shape_cast %104 : vector<8x288xf32> to vector<1x8x288xf32>
    tpu.vector_store %arg5[%c1_54, %c0_55, %c0_56], %107 {strides = array<i32>} : memref<2x8x288xf32, #tpu.memory_space<vmem>>, vector<1x8x288xf32>,
    return
  }
  func.func @transform_0(%arg0: i32) -> (i32, i32, i32) {
    %c0_i32 = arith.constant 0 : i32
    %c0_i32_0 = arith.constant 0 : i32
    %c0_i32_1 = arith.constant 0 : i32
    %c0_i32_2 = arith.constant 0 : i32
    return %c0_i32, %c0_i32_0, %c0_i32_1 : i32, i32, i32
  }
  func.func @transform_1(%arg0: i32) -> (i32, i32) {
    %c0_i32 = arith.constant 0 : i32
    %c0_i32_0 = arith.constant 0 : i32
    %c0_i32_1 = arith.constant 0 : i32
    return %c0_i32, %c0_i32_0 : i32, i32
  }
  func.func @transform_2(%arg0: i32) -> (i32, i32) {
    %c0_i32 = arith.constant 0 : i32
    %c0_i32_0 = arith.constant 0 : i32
    %c0_i32_1 = arith.constant 0 : i32
    return %c0_i32, %c0_i32_0 : i32, i32
  }
  func.func @transform_3(%arg0: i32) -> (i32, i32, i32) {
    %c0_i32 = arith.constant 0 : i32
    %c0_i32_0 = arith.constant 0 : i32
    %c0_i32_1 = arith.constant 0 : i32
    %c0_i32_2 = arith.constant 0 : i32
    return %c0_i32, %c0_i32_0, %c0_i32_1 : i32, i32, i32
  }
  func.func @transform_4(%arg0: i32) -> (i32, i32, i32) {
    %c0_i32 = arith.constant 0 : i32
    %c0_i32_0 = arith.constant 0 : i32
    %c0_i32_1 = arith.constant 0 : i32
    %c0_i32_2 = arith.constant 0 : i32
    return %c0_i32, %c0_i32_0, %c0_i32_1 : i32, i32, i32
  }
}

</mosaic_0001>

<bundles_post_ra>
// kernel: conv_with_norms.1
= control target key start
LH: loop header
LB: loop body
LE: loop exit
PB: predicated region body
PF: predicated region fallthrough
CT: control target
= control target key end

     0   :  { %s860_s19 = smov 110   ;;  %s862_s20 = smov 126   ;;  %v868_v24 = vmov 0   ;;  %vm75_vm0 = vcmask 900096   ;;  %vm38_vm1 = vcmask 1039360   ;;  %vm57_vm2 = vcmask 1031168   ;;  %s1131_s0 = inlined_call_operand.vmem [shape: bf16[2,4,432], index: 0, kind: input, shape index: {}]   ;;  %s1132_s1 = inlined_call_operand.vmem [shape: bf16[8,36], index: 1, kind: input, shape index: {}]   ;;  %s1133_s2 = inlined_call_operand.vmem [shape: f32[1,768], index: 2, kind: input, shape index: {}]   ;;  %s1134_s3 = inlined_call_operand.vmem [shape: f32[3,8,1], index: 3, kind: input, shape index: {}]   ;;  %s1135_s4 = inlined_call_operand.vmem [shape: f32[2,8,288], index: 4, kind: output, shape index: {}]  }
   0x1   :  { %v18_v0 = vld [vmem:[%s1131_s0] sm:$0xff]  ;;  %v664_v1 = vld [vmem:[%s1131_s0 + $0x8] sm:$0xff]  ;;  %s861_s0 = smov 127   ;;  %s863_s21 = smov 108   ;;  %429 = vmatprep.mubr.bf16.mxu0 %v868_v24  ;;  %470 = vmatprep.mubr.bf16.mxu1 %v868_v24  ;;  %vm111_vm3 = vcmask 883712   ;;  %vm93_vm4 = vcmask 891904  }
   0x2   :  { %v19_v2 = vunpack.c.l.bf16 %v18_v0  ;;  %v20_v3 = vunpack.c.h.bf16 %v18_v0  ;;  %v900_v4 = vunpack.c.l.bf16 %v664_v1  ;;  %v178_v5 = vunpack.c.h.bf16 %v664_v1  ;;  %s864_s22 = smov 109   ;;  %s865_s23 = smov 91   ;;  %844 = vset.pattern.permute.xlu0 %v868_v24  ;;  %845 = vset.pattern.permute.xlu1 %v868_v24 }
   0x3   :  { %s866_s24 = smov 92   ;;  %s867_s25 = smov 90   ;;  %vm147_vm5 = vcmask 744448   ;;  %vm129_vm6 = vcmask 752640   ;;  %vm165_vm7 = vcmask 736256   ;;  %vm378_vm8 = vcmask 1041408  }
   0x4   :  { %v29_v6 = vcombine.low %v20_v3, %v20_v3  ;;  %25 = vst [vmem:[#allocation2] sm:$0xf] %v19_v2  ;;  %27 = vst [vmem:[#allocation2 + $0x10] sm:$0xf] %v20_v3  ;;  %v28_v7 = vcombine.low %v19_v2, %v19_v2  ;;  %v186_v8 = vcombine.low %v900_v4, %v900_v4  ;;  %vm374_vm9 = vcmask 293888  }
   0x5   :  { %183 = vst [vmem:[#allocation2 + $0x18] sm:$0xf] %v900_v4  ;;  %v23_v9 = vcombine.high %v19_v2, %v19_v2  ;;  %185 = vst [vmem:[#allocation2 + $0x28] sm:$0xf] %v178_v5  ;;  %v181_v13 = vcombine.high %v900_v4, %v900_v4  ;;  %v694_v14 = vpack.i.bf16 %v900_v4, %v19_v2  ;;  %vm654_vm10 = vcmask 261120  }
   0x6   :  { %v699_v10 = vpack.i.bf16 %v29_v6, %v19_v2  ;;  %v704_v11 = vpack.i.bf16 %v186_v8, %v28_v7  ;;  %v48_v15 = vcombine.high %v20_v3, %v20_v3  ;;  %v764_v19 = vpack.i.bf16 %v20_v3, %v900_v4 }
   0x7   :  { %26 = vst [vmem:[#allocation2 + $0x8] sm:$0xf] %v23_v9  ;;  %v689_v12 = vpack.i.bf16 %v20_v3, %v23_v9  ;;  %184 = vst [vmem:[#allocation2 + $0x20] sm:$0xf] %v181_v13  ;;  %v754_v17 = vpack.i.bf16 %v23_v9, %v19_v2  ;;  %v187_v20 = vcombine.low %v178_v5, %v178_v5 }
   0x8   :  { %700 = vrot.lane.b32.xlu1 %v699_v10, %s860_s19  ;;  %685 = vrot.lane.b32.xlu0 %v699_v10, %s861_s0  ;;  %v759_v16 = vpack.i.bf16 %v48_v15, %v20_v3  ;;  %v769_v18 = vpack.i.bf16 %v48_v15, %v181_v13  ;;  %v205_v22 = vcombine.high %v178_v5, %v178_v5 }
   0x9   :  { %v779_v21 = vpack.i.bf16 %v178_v5, %v187_v20  ;;  %v834_v25 = vpack.i.bf16 %v181_v13, %v900_v4 }
   0xa   :  { %v784_v23 = vpack.i.bf16 %v205_v22, %v178_v5 }
   0xc   :  { %705 = vrot.lane.b32.xlu1 %v704_v11, %s861_s0  ;;  %690 = vrot.lane.b32.xlu0 %v689_v12, %s862_s20 }
  0x10   :  { %710 = vrot.lane.b32.xlu1 %v704_v11, %s860_s19  ;;  %695 = vrot.lane.b32.xlu0 %v694_v14, %s862_s20 }
  0x14   :  { %720 = vrot.lane.b32.xlu1 %v699_v10, %s863_s21  ;;  %715 = vrot.lane.b32.xlu0 %v689_v12, %s864_s22 }
  0x18   :  { %730 = vrot.lane.b32.xlu1 %v699_v10, %s865_s23  ;;  %725 = vrot.lane.b32.xlu0 %v689_v12, %s866_s24 }
  0x1c   :  { %740 = vrot.lane.b32.xlu1 %v704_v11, %s863_s21  ;;  %735 = vrot.lane.b32.xlu0 %v694_v14, %s864_s22 }
  0x20   :  { %750 = vrot.lane.b32.xlu1 %v704_v11, %s865_s23  ;;  %745 = vrot.lane.b32.xlu0 %v694_v14, %s866_s24 }
  0x24   :  { %760 = vrot.lane.b32.xlu1 %v759_v16, %s867_s25  ;;  %755 = vrot.lane.b32.xlu0 %v754_v17, %s867_s25 }
  0x28   :  { %770 = vrot.lane.b32.xlu1 %v769_v18, %s862_s20  ;;  %765 = vrot.lane.b32.xlu0 %v764_v19, %s861_s0 }
  0x2c   :  { %780 = vrot.lane.b32.xlu1 %v779_v21, %s861_s0  ;;  %775 = vrot.lane.b32.xlu0 %v764_v19, %s860_s19 }
  0x30   :  { %790 = vrot.lane.b32.xlu1 %v779_v21, %s860_s19  ;;  %785 = vrot.lane.b32.xlu0 %v784_v23, %s862_s20 }
  0x34   :  { %800 = vrot.lane.b32.xlu1 %v764_v19, %s863_s21  ;;  %795 = vrot.lane.b32.xlu0 %v769_v18, %s864_s22 }
  0x38   :  { %810 = vrot.lane.b32.xlu1 %v764_v19, %s865_s23  ;;  %805 = vrot.lane.b32.xlu0 %v769_v18, %s866_s24 }
  0x3c   :  { %820 = vrot.lane.b32.xlu1 %v779_v21, %s863_s21  ;;  %815 = vrot.lane.b32.xlu0 %v784_v23, %s864_s22 }
  0x40   :  { %830 = vrot.lane.b32.xlu1 %v779_v21, %s865_s23  ;;  %825 = vrot.lane.b32.xlu0 %v784_v23, %s866_s24 }
  0x44   :  { %840 = vrot.lane.b32.xlu1 %v784_v23, %s867_s25  ;;  %835 = vrot.lane.b32.xlu0 %v834_v25, %s867_s25 }
  0x7a   :  { %v942_v26 = vpop.permute.xlu1 %700  ;;  %v944_v27 = vpop.permute.xlu0 %685 }
  0x7b   :  { %v703_v28 = vunpack.i.h.bf16 %v942_v26  ;;  %v702_v29 = vunpack.i.l.bf16 %v942_v26  ;;  %v688_v30 = vunpack.i.h.bf16 %v944_v27  ;;  %v687_v31 = vunpack.i.l.bf16 %v944_v27 }
  0x7d   :  { %v77_v32 = vsel %vm75_vm0, %v702_v29, %v703_v28  ;;  %v40_v33 = vsel %vm38_vm1, %v687_v31, %v688_v30 }
  0x7e   :  { %83 = vst [vmem:[#allocation2 + $0x38] sm:$0xf0] %v77_v32  ;;  %46 = vst [vmem:[#allocation2 + $0x8] sm:$0xf0] %v40_v33  ;;  %v956_v34 = vpop.permute.xlu1 %705  ;;  %v958_v35 = vpop.permute.xlu0 %690 }
  0x7f   :  { %v707_v36 = vunpack.i.l.bf16 %v956_v34  ;;  %v693_v37 = vunpack.i.h.bf16 %v958_v35  ;;  %v692_v38 = vunpack.i.l.bf16 %v958_v35 }
  0x81   :  { %v39_v39 = vsel %vm38_vm1, %v707_v36, %v687_v31  ;;  %v59_v40 = vsel %vm57_vm2, %v692_v38, %v693_v37  ;;  %v708_v36 = vunpack.i.h.bf16 %v956_v34 }
  0x82   :  { %45 = vst [vmem:[#allocation2] sm:$0xf0] %v39_v39  ;;  %65 = vst [vmem:[#allocation2 + $0x38] sm:$0xf] %v59_v40  ;;  %v967_v41 = vpop.permute.xlu1 %710  ;;  %v969_v42 = vpop.permute.xlu0 %695 }
  0x83   :  { %v712_v43 = vunpack.i.l.bf16 %v967_v41  ;;  %v697_v44 = vunpack.i.l.bf16 %v969_v42 }
  0x85   :  { %v76_v45 = vsel %vm75_vm0, %v712_v43, %v702_v29  ;;  %v58_v46 = vsel %vm57_vm2, %v697_v44, %v692_v38  ;;  %v327_v55 = vld [vmem:[#allocation2 + $0x8] sm:$0xff]  ;;  %v698_v38 = vunpack.i.h.bf16 %v969_v42 }
  0x86   :  { %82 = vst [vmem:[#allocation2 + $0x30] sm:$0xf0] %v76_v45  ;;  %64 = vst [vmem:[#allocation2 + $0x30] sm:$0xf] %v58_v46  ;;  %v975_v47 = vpop.permute.xlu1 %720  ;;  %v977_v48 = vpop.permute.xlu0 %715 }
  0x87   :  { %v723_v49 = vunpack.i.h.bf16 %v975_v47  ;;  %v722_v50 = vunpack.i.l.bf16 %v975_v47  ;;  %v718_v51 = vunpack.i.h.bf16 %v977_v48  ;;  %v717_v52 = vunpack.i.l.bf16 %v977_v48 }
  0x89   :  { %v113_v53 = vsel %vm111_vm3, %v722_v50, %v723_v49  ;;  %v95_v54 = vsel %vm93_vm4, %v717_v52, %v718_v51  ;;  %v333_v56 = vld [vmem:[#allocation2 + $0x38] sm:$0xff]  ;;  %v326_v2 = vld [vmem:[#allocation2] sm:$0xff] }
  0x8a   :  { %119 = vst [vmem:[#allocation2 + $0x68] sm:$0xf0] %v113_v53  ;;  %101 = vst [vmem:[#allocation2 + $0x68] sm:$0xf] %v95_v54  ;;  %v989_v57 = vpop.permute.xlu1 %730  ;;  %v991_v58 = vpop.permute.xlu0 %725  ;;  %v357_v59 = vpack.c.bf16 %v333_v56, %v327_v55  ;;  %v713_v55 = vunpack.i.h.bf16 %v967_v41 }
  0x8b   :  { %v733_v60 = vunpack.i.h.bf16 %v989_v57  ;;  %v732_v61 = vunpack.i.l.bf16 %v989_v57  ;;  %v728_v62 = vunpack.i.h.bf16 %v991_v58  ;;  %v727_v63 = vunpack.i.l.bf16 %v991_v58 }
  0x8c   :  { %397 = vmatprep.subr.bf16.mxu0 %v357_v59 }
  0x8d   :  { %v149_v0 = vsel %vm147_vm5, %v732_v61, %v733_v60  ;;  %v131_v1 = vsel %vm129_vm6, %v727_v63, %v728_v62  ;;  %v332_v3 = vld [vmem:[#allocation2 + $0x30] sm:$0xff] }
  0x8e   :  { %155 = vst [vmem:[#allocation2 + $0x98] sm:$0xf0] %v149_v0  ;;  %137 = vst [vmem:[#allocation2 + $0x98] sm:$0xf] %v131_v1  ;;  %v1003_v4 = vpop.permute.xlu1 %740  ;;  %v1005_v5 = vpop.permute.xlu0 %735  ;;  %v356_v6 = vpack.c.bf16 %v332_v3, %v326_v2 }
  0x8f   :  { %v742_v7 = vunpack.i.l.bf16 %v1003_v4  ;;  %v737_v8 = vunpack.i.l.bf16 %v1005_v5 }
  0x90   :  { %398 = vmatpush1.bf16.msra.mxu0 %v356_v6 }
  0x91   :  { %v112_v9 = vsel %vm111_vm3, %v742_v7, %v722_v50  ;;  %v94_v10 = vsel %vm93_vm4, %v737_v8, %v717_v52  ;;  %v339_v17 = vld [vmem:[#allocation2 + $0x68] sm:$0xff] }
  0x92   :  { %118 = vst [vmem:[#allocation2 + $0x60] sm:$0xf0] %v112_v9  ;;  %100 = vst [vmem:[#allocation2 + $0x60] sm:$0xf] %v94_v10  ;;  %v1011_v11 = vpop.permute.xlu1 %750  ;;  %v1013_v12 = vpop.permute.xlu0 %745 }
  0x93   :  { %v752_v13 = vunpack.i.l.bf16 %v1011_v11  ;;  %v747_v14 = vunpack.i.l.bf16 %v1013_v12 }
  0x95   :  { %v148_v15 = vsel %vm147_vm5, %v752_v13, %v732_v61  ;;  %v130_v16 = vsel %vm129_vm6, %v747_v14, %v727_v63  ;;  %v345_v18 = vld [vmem:[#allocation2 + $0x98] sm:$0xff] }
  0x96   :  { %154 = vst [vmem:[#allocation2 + $0x90] sm:$0xf0] %v148_v15  ;;  %136 = vst [vmem:[#allocation2 + $0x90] sm:$0xf] %v130_v16  ;;  %v761_v19 = vpop.permute.xlu1 %760  ;;  %v756_v20 = vpop.permute.xlu0 %755  ;;  %v363_v21 = vpack.c.bf16 %v345_v18, %v339_v17 }
  0x97   :  { %v763_v22 = vunpack.i.h.bf16 %v761_v19  ;;  %v762_v23 = vunpack.i.l.bf16 %v761_v19  ;;  %v758_v25 = vunpack.i.h.bf16 %v756_v20  ;;  %v757_v29 = vunpack.i.l.bf16 %v756_v20  ;;  %v1048_v19 = vld [vmem:[%s1132_s1] sm:$0xf] }
  0x98   :  { %399 = vmatprep.subr.bf16.mxu0 %v363_v21  ;;  %v743_v20 = vunpack.i.h.bf16 %v1003_v4  ;;  %v738_v21 = vunpack.i.h.bf16 %v1005_v5 }
  0x99   :  { %v168_v31 = vsel %vm165_vm7, %v762_v23, %v763_v22  ;;  %v167_v32 = vsel %vm165_vm7, %v758_v25, %v762_v23  ;;  %v166_v33 = vsel %vm165_vm7, %v757_v29, %v758_v25  ;;  %v338_v53 = vld [vmem:[#allocation2 + $0x60] sm:$0xff] }
  0x9a   :  { %174 = vst [vmem:[#allocation2 + $0xd0] sm:$0xf] %v168_v31  ;;  %173 = vst [vmem:[#allocation2 + $0xc8] sm:$0xf] %v167_v32  ;;  %v771_v39 = vpop.permute.xlu1 %770  ;;  %v766_v40 = vpop.permute.xlu0 %765 }
  0x9b   :  { %172 = vst [vmem:[#allocation2 + $0xc0] sm:$0xf] %v166_v33  ;;  %v773_v43 = vunpack.i.h.bf16 %v771_v39  ;;  %v772_v44 = vunpack.i.l.bf16 %v771_v39  ;;  %v768_v45 = vunpack.i.h.bf16 %v766_v40  ;;  %v767_v46 = vunpack.i.l.bf16 %v766_v40 }
  0x9d   :  { %v60_v50 = vsel %vm57_vm2, %v693_v37, %v773_v43  ;;  %v214_v52 = vsel %vm57_vm2, %v698_v38, %v772_v44  ;;  %v41_v34 = vsel %vm38_vm1, %v688_v30, %v768_v45  ;;  %v196_v42 = vsel %vm38_vm1, %v708_v36, %v767_v46  ;;  %v344_v54 = vld [vmem:[#allocation2 + $0x90] sm:$0xff] }
  0x9e   :  { %66 = vst [vmem:[#allocation2 + $0x40] sm:$0xf] %v60_v50  ;;  %220 = vst [vmem:[#allocation2 + $0x48] sm:$0xf] %v214_v52  ;;  %v781_v56 = vpop.permute.xlu1 %780  ;;  %v776_v35 = vpop.permute.xlu0 %775  ;;  %v362_v59 = vpack.c.bf16 %v344_v54, %v338_v53  ;;  %v748_v45 = vunpack.i.h.bf16 %v1013_v12 }
  0x9f   :  { %47 = vst [vmem:[#allocation2 + $0x10] sm:$0xf0] %v41_v34  ;;  %202 = vst [vmem:[#allocation2 + $0x18] sm:$0xf0] %v196_v42  ;;  %v783_v37 = vunpack.i.h.bf16 %v781_v56  ;;  %v782_v61 = vunpack.i.l.bf16 %v781_v56  ;;  %v778_v63 = vunpack.i.h.bf16 %v776_v35  ;;  %v777_v0 = vunpack.i.l.bf16 %v776_v35 }
  0xa0   :  { %400 = vmatpush1.bf16.msra.mxu0 %v362_v59 }
  0xa1   :  { %v197_v27 = vsel %vm38_vm1, %v767_v46, %v782_v61  ;;  %v198_v30 = vsel %vm38_vm1, %v782_v61, %v783_v37  ;;  %v78_v41 = vsel %vm75_vm0, %v703_v28, %v778_v63  ;;  %v231_v1 = vsel %vm75_vm0, %v713_v55, %v777_v0  ;;  %v351_v2 = vld [vmem:[#allocation2 + $0xc8] sm:$0xf] }
  0xa2   :  { %v350_v3 = vld [vmem:[#allocation2 + $0xc0] sm:$0xf]  ;;  %203 = vst [vmem:[#allocation2 + $0x20] sm:$0xf0] %v197_v27  ;;  %204 = vst [vmem:[#allocation2 + $0x28] sm:$0xf0] %v198_v30  ;;  %v791_v6 = vpop.permute.xlu1 %790  ;;  %v786_v7 = vpop.permute.xlu0 %785  ;;  %v369_v8 = vpack.c.bf16 %v351_v2, %v351_v2 }
  0xa3   :  { %84 = vst [vmem:[#allocation2 + $0x40] sm:$0xf0] %v78_v41  ;;  %237 = vst [vmem:[#allocation2 + $0x48] sm:$0xf0] %v231_v1  ;;  %v368_v9 = vpack.c.bf16 %v350_v3, %v350_v3  ;;  %v793_v10 = vunpack.i.h.bf16 %v791_v6  ;;  %v792_v13 = vunpack.i.l.bf16 %v791_v6  ;;  %v788_v14 = vunpack.i.h.bf16 %v786_v7 }
  0xa4   :  { %v787_v15 = vunpack.i.l.bf16 %v786_v7  ;;  %665 = vmatprep.subr.msk.bf16.mxu0 %vm378_vm8, %v369_v8 }
  0xa5   :  { %v380_v26 = vsel %vm378_vm8, %v368_v9, 0  ;;  %v232_v28 = vsel %vm75_vm0, %v777_v0, %v792_v13  ;;  %v233_v16 = vsel %vm75_vm0, %v792_v13, %v793_v10 }
  0xa6   :  { %v215_v17 = vsel %vm57_vm2, %v772_v44, %v787_v15  ;;  %v216_v18 = vsel %vm57_vm2, %v787_v15, %v788_v14  ;;  %402 = vmatpush1.bf16.msra.mxu0 %v380_v26  ;;  %238 = vst [vmem:[#allocation2 + $0x50] sm:$0xf0] %v232_v28  ;;  %239 = vst [vmem:[#allocation2 + $0x58] sm:$0xf0] %v233_v16  ;;  %v801_v22 = vpop.permute.xlu1 %800  ;;  %v796_v23 = vpop.permute.xlu0 %795  ;;  %v329_v33 = vld [vmem:[#allocation2 + $0x18] sm:$0xff]  ;;  %v328_v40 = vld [vmem:[#allocation2 + $0x10] sm:$0xff]  ;;  %v753_v44 = vunpack.i.h.bf16 %v1011_v11 }
  0xa7   :  { %221 = vst [vmem:[#allocation2 + $0x50] sm:$0xf] %v215_v17  ;;  %222 = vst [vmem:[#allocation2 + $0x58] sm:$0xf] %v216_v18  ;;  %v803_v25 = vunpack.i.h.bf16 %v801_v22  ;;  %v802_v29 = vunpack.i.l.bf16 %v801_v22  ;;  %v798_v31 = vunpack.i.h.bf16 %v796_v23  ;;  %v797_v32 = vunpack.i.l.bf16 %v796_v23 }
  0xa9   :  { %666 = vmatmul.mubr.msk.bf16.vlgmr.msra.gmra.mrb[0].mxu0 %vm374_vm9, %v1048_v19  ;;  %v114_v4 = vsel %vm111_vm3, %v723_v49, %v803_v25  ;;  %v265_v5 = vsel %vm111_vm3, %v743_v20, %v802_v29  ;;  %v96_v36 = vsel %vm93_vm4, %v718_v51, %v798_v31  ;;  %v248_v38 = vsel %vm93_vm4, %v738_v21, %v797_v32  ;;  %v331_v42 = vld [vmem:[#allocation2 + $0x28] sm:$0xff]  ;;  %v330_v55 = vld [vmem:[#allocation2 + $0x20] sm:$0xff] }
  0xaa   :  { %v335_v39 = vld [vmem:[#allocation2 + $0x48] sm:$0xff]  ;;  %v334_v43 = vld [vmem:[#allocation2 + $0x40] sm:$0xff]  ;;  %511 = vmatprep.mubr.bf16.mxu0 %v868_v24  ;;  %120 = vst [vmem:[#allocation2 + $0x70] sm:$0xf0] %v114_v4  ;;  %271 = vst [vmem:[#allocation2 + $0x78] sm:$0xf0] %v265_v5  ;;  %v811_v47 = vpop.permute.xlu1 %810  ;;  %v806_v49 = vpop.permute.xlu0 %805 }
  0xab   :  { %102 = vst [vmem:[#allocation2 + $0x70] sm:$0xf] %v96_v36  ;;  %254 = vst [vmem:[#allocation2 + $0x78] sm:$0xf] %v248_v38  ;;  %v359_v48 = vpack.c.bf16 %v335_v39, %v329_v33  ;;  %v358_v46 = vpack.c.bf16 %v334_v43, %v328_v40  ;;  %v813_v51 = vunpack.i.h.bf16 %v811_v47  ;;  %v812_v50 = vunpack.i.l.bf16 %v811_v47  ;;  %v352_v4 = vld [vmem:[#allocation2 + $0xd0] sm:$0xf] }
  0xac   :  { %v808_v52 = vunpack.i.h.bf16 %v806_v49  ;;  %v807_v34 = vunpack.i.l.bf16 %v806_v49  ;;  %v370_v43 = vpack.c.bf16 %v352_v4, %v352_v4 }
  0xad   :  { %438 = vmatprep.subr.bf16.mxu1 %v359_v48  ;;  %v150_v24 = vsel %vm147_vm5, %v733_v60, %v813_v51  ;;  %v299_v11 = vsel %vm147_vm5, %v753_v44, %v812_v50 }
  0xae   :  { %v132_v12 = vsel %vm129_vm6, %v728_v62, %v808_v52  ;;  %v282_v53 = vsel %vm129_vm6, %v748_v45, %v807_v34  ;;  %439 = vmatpush1.bf16.msra.mxu1 %v358_v46  ;;  %v337_v54 = vld [vmem:[#allocation2 + $0x58] sm:$0xff]  ;;  %v336_v56 = vld [vmem:[#allocation2 + $0x50] sm:$0xff]  ;;  %156 = vst [vmem:[#allocation2 + $0xa0] sm:$0xf0] %v150_v24  ;;  %305 = vst [vmem:[#allocation2 + $0xa8] sm:$0xf0] %v299_v11  ;;  %v821_v35 = vpop.permute.xlu1 %820  ;;  %v816_v57 = vpop.permute.xlu0 %815  ;;  %v525_v52 = vlaneseq }
  0xaf   :  { %138 = vst [vmem:[#allocation2 + $0xa0] sm:$0xf] %v132_v12  ;;  %288 = vst [vmem:[#allocation2 + $0xa8] sm:$0xf] %v282_v53  ;;  %v361_v59 = vpack.c.bf16 %v337_v54, %v331_v42  ;;  %v360_v60 = vpack.c.bf16 %v336_v56, %v330_v55  ;;  %v823_v37 = vunpack.i.h.bf16 %v821_v35  ;;  %v822_v61 = vunpack.i.l.bf16 %v821_v35  ;;  %v523_v24 = vld [vmem:[%s1133_s2] sm:$0x3f] }
  0xb0   :  { %v818_v63 = vunpack.i.h.bf16 %v816_v57  ;;  %v817_v58 = vunpack.i.l.bf16 %v816_v57  ;;  %v386_v51 = vsel %vm378_vm8, %v370_v43, 0 }
  0xb1   :  { %479 = vmatprep.subr.bf16.mxu0 %v361_v59  ;;  %v266_v62 = vsel %vm111_vm3, %v802_v29, %v822_v61  ;;  %v267_v0 = vsel %vm111_vm3, %v822_v61, %v823_v37 }
  0xb2   :  { %v249_v27 = vsel %vm93_vm4, %v797_v32, %v817_v58  ;;  %v250_v30 = vsel %vm93_vm4, %v817_v58, %v818_v63  ;;  %480 = vmatpush1.bf16.msra.mxu0 %v360_v60  ;;  %272 = vst [vmem:[#allocation2 + $0x80] sm:$0xf0] %v266_v62  ;;  %273 = vst [vmem:[#allocation2 + $0x88] sm:$0xf0] %v267_v0  ;;  %v831_v41 = vpop.permute.xlu1 %830  ;;  %v826_v1 = vpop.permute.xlu0 %825  ;;  %v341_v8 = vld [vmem:[#allocation2 + $0x78] sm:$0xff]  ;;  %v340_v26 = vld [vmem:[#allocation2 + $0x70] sm:$0xff] }
  0xb3   :  { %255 = vst [vmem:[#allocation2 + $0x80] sm:$0xf] %v249_v27  ;;  %256 = vst [vmem:[#allocation2 + $0x88] sm:$0xf] %v250_v30  ;;  %v833_v2 = vunpack.i.h.bf16 %v831_v41  ;;  %v832_v3 = vunpack.i.l.bf16 %v831_v41  ;;  %v828_v6 = vunpack.i.h.bf16 %v826_v1  ;;  %v827_v7 = vunpack.i.l.bf16 %v826_v1 }
  0xb5   :  { %v300_v9 = vsel %vm147_vm5, %v812_v50, %v832_v3  ;;  %v301_v10 = vsel %vm147_vm5, %v832_v3, %v833_v2  ;;  %v283_v13 = vsel %vm129_vm6, %v807_v34, %v827_v7  ;;  %v284_v14 = vsel %vm129_vm6, %v827_v7, %v828_v6 }
  0xb6   :  { %v347_v15 = vld [vmem:[#allocation2 + $0xa8] sm:$0xff]  ;;  %v346_v28 = vld [vmem:[#allocation2 + $0xa0] sm:$0xff]  ;;  %306 = vst [vmem:[#allocation2 + $0xb0] sm:$0xf0] %v300_v9  ;;  %307 = vst [vmem:[#allocation2 + $0xb8] sm:$0xf0] %v301_v10  ;;  %v841_v16 = vpop.permute.xlu1 %840  ;;  %v836_v17 = vpop.permute.xlu0 %835 }
  0xb7   :  { %289 = vst [vmem:[#allocation2 + $0xb0] sm:$0xf] %v283_v13  ;;  %290 = vst [vmem:[#allocation2 + $0xb8] sm:$0xf] %v284_v14  ;;  %v365_v18 = vpack.c.bf16 %v347_v15, %v341_v8  ;;  %v364_v20 = vpack.c.bf16 %v346_v28, %v340_v26  ;;  %v843_v21 = vunpack.i.h.bf16 %v841_v16  ;;  %v842_v22 = vunpack.i.l.bf16 %v841_v16 }
  0xb8   :  { %v838_v23 = vunpack.i.h.bf16 %v836_v17  ;;  %v837_v25 = vunpack.i.l.bf16 %v836_v17  ;;  %v526_v34 = vshrl.u32 %v525_v52, 7 }
  0xb9   :  { %440 = vmatprep.subr.bf16.mxu1 %v365_v18  ;;  %v318_v29 = vsel %vm165_vm7, %v842_v22, %v843_v21 }
  0xba   :  { %v317_v31 = vsel %vm165_vm7, %v838_v23, %v842_v22  ;;  %v316_v32 = vsel %vm165_vm7, %v837_v25, %v838_v23  ;;  %441 = vmatpush1.bf16.msra.mxu1 %v364_v20  ;;  %324 = vst [vmem:[#allocation2 + $0xe8] sm:$0xf] %v318_v29  ;;  %v343_v33 = vld [vmem:[#allocation2 + $0x88] sm:$0xff]  ;;  %v342_v36 = vld [vmem:[#allocation2 + $0x80] sm:$0xff]  ;;  %v527_v42 = vsub.s32 0, %v526_v34  ;;  %v531_v11 = vsub.s32 1, %v526_v34 }
  0xbb   :  { %323 = vst [vmem:[#allocation2 + $0xe0] sm:$0xf] %v317_v31  ;;  %322 = vst [vmem:[#allocation2 + $0xd8] sm:$0xf] %v316_v32  ;;  %v535_v60 = vsub.s32 2, %v526_v34  ;;  %v539_v37 = vsub.s32 3, %v526_v34 }
  0xbc   :  { %v528_v12 = vrot.slane %v523_v24, %v527_v42  ;;  %v532_v53 = vrot.slane %v523_v24, %v531_v11  ;;  %v543_v61 = vsub.s32 4, %v526_v34  ;;  %v547_v0 = vsub.s32 5, %v526_v34  ;;  %v520_v42 = vld [vmem:[%s1134_s3] sm:$0xff] }
  0xbd   :  { %v536_v63 = vrot.slane %v523_v24, %v535_v60  ;;  %v540_v58 = vrot.slane %v523_v24, %v539_v37 }
  0xbe   :  { %v349_v5 = vld [vmem:[#allocation2 + $0xb8] sm:$0xff]  ;;  %v348_v38 = vld [vmem:[#allocation2 + $0xb0] sm:$0xff]  ;;  %v544_v62 = vrot.slane %v523_v24, %v543_v61  ;;  %v548_v14 = vrot.slane %v523_v24, %v547_v0 }
  0xbf   :  { %v367_v39 = vpack.c.bf16 %v349_v5, %v343_v33  ;;  %v366_v40 = vpack.c.bf16 %v348_v38, %v342_v36 }
  0xc1   :  { %481 = vmatprep.subr.bf16.mxu0 %v367_v39  ;;  %v355_v45 = vld [vmem:[#allocation2 + $0xe8] sm:$0xf] }
  0xc2   :  { %482 = vmatpush1.bf16.msra.mxu0 %v366_v40  ;;  %v353_v44 = vld [vmem:[#allocation2 + $0xd8] sm:$0xf]  ;;  %v354_v47 = vld [vmem:[#allocation2 + $0xe0] sm:$0xf]  ;;  %v373_v48 = vpack.c.bf16 %v355_v45, %v355_v45 }
  0xc3   :  { %v371_v49 = vpack.c.bf16 %v353_v44, %v353_v44  ;;  %v372_v46 = vpack.c.bf16 %v354_v47, %v354_v47 }
  0xc4   :  { %669 = vmatprep.subr.msk.bf16.mxu0 %vm378_vm8, %v373_v48 }
  0xc5   :  { %667 = vmatprep.subr.msk.bf16.mxu1 %vm378_vm8, %v371_v49  ;;  %v392_v50 = vsel %vm378_vm8, %v372_v46, 0 }
  0xc6   :  { %443 = vmatpush1.bf16.msra.mxu1 %v386_v51  ;;  %484 = vmatpush1.bf16.msra.mxu0 %v392_v50 }
  0xc9   :  { %668 = vmatmul.mubr.msk.bf16.vlgmr.msra.gmra.mrb[0].mxu1 %vm374_vm9, %v1048_v19  ;;  %670 = vmatmul.mubr.msk.bf16.vlgmr.msra.gmra.mrb[4].mxu0 %vm374_vm9, %v1048_v19 }
 0x17c   :  { %v1095_v54 = vpop.f32.mrb[0].mxu0 }
 0x17d   :  { %v555_v55 = vmul.f32 %v528_v12, %v1095_v54  ;;  %v1098_v56 = vpop.f32.mrb[1].mxu0 }
 0x17e   :  { %v556_v35 = vmul.f32 %v532_v53, %v1098_v56  ;;  %v435_v57 = vpop.f32.mrb[2].mxu0 }
 0x17f   :  { %v436_v19 = vpop.f32.mrb[3].mxu0 }
 0x180   :  { %v561_v59 = vadd.f32 %v556_v35, %v555_v55 }
 0x19c   :  { %v472_v27 = vpop.f32.mrb[0].mxu1  ;;  %v513_v30 = vpop.f32.mrb[4].mxu0 }
 0x19d   :  { %v557_v41 = vmul.f32 %v536_v63, %v472_v27  ;;  %v474_v1 = vpop.f32.mrb[1].mxu1  ;;  %v515_v2 = vpop.f32.mrb[5].mxu0  ;;  %v559_v9 = vmul.f32 %v544_v62, %v513_v30 }
 0x19e   :  { %v558_v3 = vmul.f32 %v540_v58, %v474_v1  ;;  %v476_v6 = vpop.f32.mrb[2].mxu1  ;;  %v517_v7 = vpop.f32.mrb[6].mxu0  ;;  %v560_v26 = vmul.f32 %v548_v14, %v515_v2 }
 0x19f   :  { %v562_v8 = vadd.f32 %v561_v59, %v557_v41  ;;  %v477_v10 = vpop.f32.mrb[3].mxu1  ;;  %v518_v13 = vpop.f32.mrb[7].mxu0 }
 0x1a1   :  { %v563_v15 = vadd.f32 %v562_v8, %v558_v3 }
 0x1a3   :  { %v564_v28 = vadd.f32 %v563_v15, %v559_v9 }
 0x1a5   :  { %v565_v16 = vadd.f32 %v564_v28, %v560_v26 }
 0x1a7   :  { %566 = vadd.xlane.f32.xlu0 %v565_v16 }
 0x234   :  { %v567_v17 = vpop.xlane.xlu0 %566 }
 0x235   :  { %v568_v18 = vmul.f32 0.001953125, %v567_v17 }
 0x237   :  { %v569_v20 = vsub.f32 %v1095_v54, %v568_v18  ;;  %v570_v21 = vsub.f32 %v1098_v56, %v568_v18  ;;  %v571_v22 = vsub.f32 %v472_v27, %v568_v18  ;;  %v572_v23 = vsub.f32 %v474_v1, %v568_v18 }
 0x238   :  { %v573_v25 = vsub.f32 %v513_v30, %v568_v18  ;;  %v574_v33 = vsub.f32 %v515_v2, %v568_v18 }
 0x239   :  { %v575_v29 = vmul.f32 %v569_v20, %v528_v12  ;;  %v576_v31 = vmul.f32 %v570_v21, %v532_v53  ;;  %v577_v32 = vmul.f32 %v571_v22, %v536_v63  ;;  %v578_v4 = vmul.f32 %v572_v23, %v540_v58  ;;  %v671_v12 = vld [vmem:[%s1134_s3 + $0x8] sm:$0xff] }
 0x23a   :  { %v579_v38 = vmul.f32 %v573_v25, %v544_v62  ;;  %v580_v43 = vmul.f32 %v574_v33, %v548_v14 }
 0x23b   :  { %v581_v5 = vmul.f32 %v575_v29, %v575_v29  ;;  %v582_v36 = vmul.f32 %v576_v31, %v576_v31  ;;  %v583_v39 = vmul.f32 %v577_v32, %v577_v32  ;;  %v584_v44 = vmul.f32 %v578_v4, %v578_v4 }
 0x23c   :  { %v585_v47 = vmul.f32 %v579_v38, %v579_v38  ;;  %v586_v48 = vmul.f32 %v580_v43, %v580_v43 }
 0x23d   :  { %v587_v40 = vadd.f32 %v582_v36, %v581_v5 }
 0x23f   :  { %v588_v45 = vadd.f32 %v587_v40, %v583_v39 }
 0x241   :  { %v589_v49 = vadd.f32 %v588_v45, %v584_v44 }
 0x243   :  { %v590_v46 = vadd.f32 %v589_v49, %v585_v47 }
 0x245   :  { %v591_v51 = vadd.f32 %v590_v46, %v586_v48 }
 0x247   :  { %592 = vadd.xlane.f32.xlu1 %v591_v51 }
 0x2d4   :  { %v593_v50 = vpop.xlane.xlu1 %592 }
 0x2d5   :  { %v594_v52 = vmul.f32 0.001953125, %v593_v50 }
 0x2d7   :  { %v595_v34 = vadd.f32 1e-05, %v594_v52 }
 0x2d9   :  { %846 = vrsqrt.f32 %v595_v34 }
 0x2e3   :  { %v847_v24 = vpop.eup %846 }
 0x2e4   :  { %v597_v11 = vmul.f32 %v847_v24, %v520_v42 }
 0x2e6   :  { %602 = vperm.xlu0 %844, %v597_v11   ;;  %v598_v53 = vmul.f32 %v597_v11, %v568_v18 }
 0x2e8   :  { %v599_v55 = vsub.f32 %v671_v12, %v598_v53 }
 0x2ea   :  { %613 = vperm.xlu1 %845, %v599_v55  }
 0x365   :  { %v603_v35 = vpop.permute.xlu0 %602 }
 0x366   :  { %v605_v57 = vmul.f32 %v603_v35, %v1095_v54  ;;  %v606_v19 = vmul.f32 %v603_v35, %v1098_v56  ;;  %v607_v59 = vmul.f32 %v603_v35, %v472_v27  ;;  %v608_v60 = vmul.f32 %v603_v35, %v474_v1 }
 0x367   :  { %v609_v37 = vmul.f32 %v603_v35, %v513_v30  ;;  %v610_v61 = vmul.f32 %v603_v35, %v515_v2 }
 0x369   :  { %v614_v63 = vpop.permute.xlu1 %613 }
 0x36a   :  { %v616_v58 = vadd.f32 %v614_v63, %v605_v57  ;;  %v617_v62 = vadd.f32 %v614_v63, %v606_v19  ;;  %v618_v0 = vadd.f32 %v614_v63, %v607_v59  ;;  %v619_v41 = vadd.f32 %v614_v63, %v608_v60 }
 0x36b   :  { %v620_v3 = vadd.f32 %v614_v63, %v609_v37  ;;  %v621_v6 = vadd.f32 %v614_v63, %v610_v61 }
 0x36c   :  { %v628_v7 = vmul.f32 0.70710677, %v616_v58  ;;  %v629_v8 = vmul.f32 0.70710677, %v617_v62  ;;  %v630_v9 = vmul.f32 0.70710677, %v618_v0 }
 0x36d   :  { %v631_v10 = vmul.f32 0.70710677, %v619_v41  ;;  %v632_v13 = vmul.f32 0.70710677, %v620_v3  ;;  %v633_v54 = vmul.f32 0.70710677, %v621_v6 }
 0x36e   :  { %848 = verf.f32 %v628_v7  ;;  %v622_v30 = vmul.f32 0.5, %v616_v58  ;;  %v623_v14 = vmul.f32 0.5, %v617_v62  ;;  %v624_v28 = vmul.f32 0.5, %v618_v0 }
 0x36f   :  { %850 = verf.f32 %v629_v8  ;;  %v625_v20 = vmul.f32 0.5, %v619_v41  ;;  %v626_v25 = vmul.f32 0.5, %v620_v3  ;;  %v627_v32 = vmul.f32 0.5, %v621_v6 }
 0x370   :  { %852 = verf.f32 %v630_v9 }
 0x371   :  { %854 = verf.f32 %v631_v10 }
 0x372   :  { %856 = verf.f32 %v632_v13 }
 0x373   :  { %858 = verf.f32 %v633_v54 }
 0x378   :  { %v849_v56 = vpop.eup %848 }
 0x379   :  { %v851_v27 = vpop.eup %850  ;;  %v640_v1 = vadd.f32 1.0, %v849_v56 }
 0x37a   :  { %v853_v2 = vpop.eup %852  ;;  %v641_v15 = vadd.f32 1.0, %v851_v27 }
 0x37b   :  { %v855_v26 = vpop.eup %854  ;;  %v642_v16 = vadd.f32 1.0, %v853_v2  ;;  %v646_v17 = vmul.f32 %v640_v1, %v622_v30 }
 0x37c   :  { %v857_v18 = vpop.eup %856  ;;  %v643_v21 = vadd.f32 1.0, %v855_v26  ;;  %v647_v22 = vmul.f32 %v641_v15, %v623_v14 }
 0x37d   :  { %v859_v23 = vpop.eup %858  ;;  %v644_v29 = vadd.f32 1.0, %v857_v18  ;;  %v648_v31 = vmul.f32 %v642_v16, %v624_v28  ;;  %652 = vst [vmem:[%s1135_s4] sm:$0xff] %v646_v17 }
 0x37e   :  { %v645_v33 = vadd.f32 1.0, %v859_v23  ;;  %v649_v4 = vmul.f32 %v643_v21, %v625_v20  ;;  %653 = vst [vmem:[%s1135_s4 + $0x8] sm:$0xff] %v647_v22 }
 0x37f   :  { %v650_v5 = vmul.f32 %v644_v29, %v626_v25  ;;  %655 = vst.msk [vmem:[%s1135_s4 + $0x10] sm:$0xff] %vm654_vm10, %v648_v31 }
 0x380   :  { %v651_v36 = vmul.f32 %v645_v33, %v627_v32  ;;  %672 = vst [vmem:[%s1135_s4 + $0x18] sm:$0xff] %v649_v4 }
 0x381   :  { %673 = vst [vmem:[%s1135_s4 + $0x20] sm:$0xff] %v650_v5 }
 0x382   :  { %674 = vst.msk [vmem:[%s1135_s4 + $0x28] sm:$0xff] %vm654_vm10, %v651_v36 }

</bundles_post_ra>
